<compile_context>
chip_gen: v7x
topology: tpu7x:2x2x1
jax: 0.10.0
libtpu: 0.0.40
codegen_flags: <defaults>
</compile_context>

<pallas_src>
import math

import jax
import jax.numpy as jnp
from jax.experimental import pallas as pl
from jax.experimental.pallas import tpu as pltpu

_LANES = 128             # full vreg lane width -> unmasked vector stores
_MAX_BLOCK_ROWS = 8192   # 8192 * 128 * 4 B = 4 MiB per f32 block


def _copy_kernel(x_ref, o_ref):
    # Straight VMEM copy of one lane-dense (block_rows, 128) slab.
    o_ref[...] = x_ref[...]


@jax.jit
def unsqueeze_freq(x: jax.Array) -> jax.Array:
    """Equivalent of torch `x.unsqueeze(-1)` for an NCHW tensor."""
    orig_shape = x.shape
    n = math.prod(orig_shape)

    # Lane-dense layout: flatten everything, pad to a whole number of
    # (rows, 128) vreg rows, with rows a multiple of 8 (sublanes) and of the
    # block size so the grid tiles evenly.
    rows = pl.cdiv(n, _LANES)
    rows = pl.cdiv(rows, 8) * 8
    block_rows = min(rows, _MAX_BLOCK_ROWS)
    rows = pl.cdiv(rows, block_rows) * block_rows
    n_pad = rows * _LANES

    flat = x.reshape(-1)
    if n_pad != n:
        flat = jnp.pad(flat, (0, n_pad - n))
    x2 = flat.reshape(rows, _LANES)

    grid = (rows // block_rows,)

    out2 = pl.pallas_call(
        _copy_kernel,
        out_shape=jax.ShapeDtypeStruct((rows, _LANES), x.dtype),
        grid_spec=pl.GridSpec(
            grid=grid,
            in_specs=[pl.BlockSpec((block_rows, _LANES), lambda i: (i, 0))],
            out_specs=pl.BlockSpec((block_rows, _LANES), lambda i: (i, 0)),
        ),
        compiler_params=pltpu.CompilerParams(
            dimension_semantics=("parallel",),
        ),
    )(x2)

    # Metadata-only reshapes: strip padding and append the trailing singleton
    # ("freq") axis, exactly x.unsqueeze(-1).
    out_flat = out2.reshape(-1)[:n]
    return out_flat.reshape(*orig_shape, 1)


if __name__ == "__main__":
    key = jax.random.PRNGKey(0)
    x = jax.random.normal(key, (2, 4, 16, 16), dtype=jnp.float32)

    y = unsqueeze_freq(x)
    jax.block_until_ready(y)

    expected = x[..., None]  # reference semantics: x.unsqueeze(-1)
    assert y.shape == (2, 4, 16, 16, 1), y.shape
    assert y.dtype == x.dtype
    assert jnp.array_equal(y, expected)

    print("KERNEL_OK")
</pallas_src>

<mosaic_0001>
module attributes {stable_mosaic.version = 11 : i64} {
  func.func @_copy_kernel(%arg0: i32, %arg1: memref<16x128xf32, #tpu.memory_space<vmem>>, %arg2: memref<16x128xf32, #tpu.memory_space<vmem>>) attributes {dimension_semantics = [#tpu.dimension_semantics<parallel>], iteration_bounds = array<i64: 1>, scalar_prefetch = 0 : i64, scratch_operands = 0 : i64, tpu.core_type = #tpu.core_type<tc>, window_params = [{transform_indices = @transform_0, window_bounds = array<i64: 16, 128>}, {transform_indices = @transform_1, window_bounds = array<i64: 16, 128>}]} {
    %c0 = arith.constant 0 : index
    %c0_0 = arith.constant 0 : index
    %0 = vector.load %arg1[%c0, %c0_0] : memref<16x128xf32, #tpu.memory_space<vmem>>, vector<16x128xf32>
    %c0_1 = arith.constant 0 : index
    %c0_2 = arith.constant 0 : index
    %1 = vector.load %arg2[%c0_1, %c0_2] : memref<16x128xf32, #tpu.memory_space<vmem>>, vector<16x128xf32>
    tpu.vector_store %arg2[%c0_1, %c0_2], %0 {strides = array<i32>} : memref<16x128xf32, #tpu.memory_space<vmem>>, vector<16x128xf32>,
    return
  }
  func.func @transform_0(%arg0: i32) -> (i32, i32) {
    %c0_i32 = arith.constant 0 : i32
    %c0_i32_0 = arith.constant 0 : i32
    return %arg0, %c0_i32 : i32, i32
  }
  func.func @transform_1(%arg0: i32) -> (i32, i32) {
    %c0_i32 = arith.constant 0 : i32
    %c0_i32_0 = arith.constant 0 : i32
    return %arg0, %c0_i32 : i32, i32
  }
}

</mosaic_0001>

<bundles_post_ra>
// kernel: unsqueeze_freq.1
= control target key start
LH: loop header
LB: loop body
LE: loop exit
PB: predicated region body
PF: predicated region fallthrough
CT: control target
= control target key end

     0   :  { %s38_s0 = inlined_call_operand.vmem [shape: f32[16,128], index: 0, kind: input, shape index: {}]   ;;  %s39_s1 = inlined_call_operand.vmem [shape: f32[16,128], index: 1, kind: output, shape index: {}]  }
   0x1   :  { %v8_v0 = vld [vmem:[%s38_s0] sm:$0xff]  ;;  %v9_v1 = vld [vmem:[%s38_s0 + $0x8] sm:$0xff] }
   0x2   :  { %10 = vst [vmem:[%s39_s1] sm:$0xff] %v8_v0  ;;  %11 = vst [vmem:[%s39_s1 + $0x8] sm:$0xff] %v9_v1 }

</bundles_post_ra>
